<compile_context>
chip_gen: v7x
topology: tpu7x:2x2x1
jax: 0.10.0
libtpu: 0.0.40
codegen_flags: <defaults>
</compile_context>

<pallas_src>
import functools

import jax
import jax.numpy as jnp
from jax.experimental import pallas as pl
from jax.experimental.pallas import tpu as pltpu


_TN_MAX = 16384            # K tile (multiple of 128): bounds per-step VMEM independent of N
_TB_MAX = 32768            # cap on batch tile (keeps lane-dense acc/out buffers small)
_TB_SINGLE_TILE_MAX = 256  # below this batch size, a single batch tile is used


def _vmem_budgets():
    """Generation-aware VMEM limits: ~3/4 of physical VMEM, capped at 96 MiB (v5e/v6e)."""
    try:
        cap = int(pltpu.get_tpu_info().vmem_capacity_bytes)
    except Exception:
        cap = 64 << 20                                 # conservative fallback: v7x physical
    vmem_limit = min((cap * 3) // 4, 96 << 20)         # 48 MiB on v7x, 96 MiB on v5e/v6e
    x_budget = vmem_limit // 2                         # budget for the two x double-buffers
    return vmem_limit, x_budget


def _choose_tiles(batch, n, itemsize, x_budget):
    """Pick (TB, TN). TB is a multiple of 128 (or the full batch); TN a multiple of 128 (or N)."""
    tn = n if n <= _TN_MAX else _TN_MAX
    if batch <= _TB_SINGLE_TILE_MAX:
        return batch, tn                               # single tile: block dims == full dims
    row_bytes = tn * itemsize
    tb = x_budget // (2 * row_bytes)                   # double-buffered x tile under budget
    tb = max(128, (tb // 128) * 128)
    tb = min(tb, _TB_MAX)
    # Guarantee >= 2 batch tiles so both v7x TensorCores stream (no-op on v5e/v6e).
    half = (((batch + 1) // 2) + 127) // 128 * 128
    tb = min(tb, half)
    if tb >= batch:
        return batch, tn
    return tb, tn


def _linear_kernel(x_ref, w_ref, o_ref, acc_ref, *, n, tn, needs_mask):
    # x_ref: [TB, TN] VMEM, w_ref: [1, TN] VMEM, o_ref: [1, TB] VMEM (lane-dense),
    # acc_ref: [1, TB] f32 VMEM scratch (resident across the K grid axis).
    k = pl.program_id(1)

    @pl.when(k == 0)
    def _():
        acc_ref[...] = jnp.zeros_like(acc_ref)

    x = x_ref[...].astype(jnp.float32)                 # [TB, TN]
    w = w_ref[...].astype(jnp.float32)                 # [1, TN] broadcasts over TB sublanes
    xw = x * w                                         # VPU elementwise
    if needs_mask:
        # Partial last K block: zero the lanes beyond N (padded VMEM contents are unspecified).
        col = jax.lax.broadcasted_iota(jnp.int32, xw.shape, 1) + k * tn
        xw = jnp.where(col < n, xw, 0.0)
    s = jnp.sum(xw, axis=-1, keepdims=True)            # [TB, 1] per-row partial dot (XLU reduce)
    acc_ref[...] += s.T                                # one relayout -> lane-dense [1, TB]

    @pl.when(k == pl.num_programs(1) - 1)
    def _():
        o_ref[...] = acc_ref[...].astype(o_ref.dtype)  # unmasked lane-dense store


def linear_forward(x, weight):
    """x: [B, N], weight: [1, N] (torch Linear layout, no transpose). Returns [B, 1]."""
    B, N = x.shape
    assert weight.shape == (1, N)
    itemsize = jnp.dtype(x.dtype).itemsize
    vmem_limit, x_budget = _vmem_budgets()
    TB, TN = _choose_tiles(B, N, itemsize, x_budget)
    nbt = pl.cdiv(B, TB)
    nk = pl.cdiv(N, TN)
    needs_mask = (nk > 1) and (N % TN != 0)

    kernel = functools.partial(_linear_kernel, n=N, tn=TN, needs_mask=needs_mask)

    cost = pl.CostEstimate(
        flops=2 * B * N,
        bytes_accessed=itemsize * (B * N + N) + itemsize * B,
        transcendentals=0,
    )

    y = pl.pallas_call(
        kernel,
        out_shape=jax.ShapeDtypeStruct((1, B), x.dtype),      # lane-dense output slab
        grid_spec=pltpu.PrefetchScalarGridSpec(
            num_scalar_prefetch=0,
            grid=(nbt, nk),                                   # batch outer, K innermost
            in_specs=[
                pl.BlockSpec((TB, TN), lambda i, k: (i, k)),  # x: batch x K tiled, pipelined
                pl.BlockSpec((1, TN), lambda i, k: (0, k)),   # w: K tiled, resident across batch
            ],
            out_specs=pl.BlockSpec((1, TB), lambda i, k: (0, i)),  # resident across K
            scratch_shapes=[pltpu.VMEM((1, TB), jnp.float32)],     # f32 accumulator
        ),
        compiler_params=pltpu.CompilerParams(
            dimension_semantics=(pltpu.PARALLEL, pltpu.ARBITRARY),
            vmem_limit_bytes=vmem_limit,
        ),
        cost_estimate=cost,
    )(x, weight)
    return y.reshape(B, 1)


def _check(batch, n, key):
    kx, kw = jax.random.split(key)
    x = jax.random.normal(kx, (batch, n), dtype=jnp.float32)
    bound = 1.0 / jnp.sqrt(jnp.float32(n))
    weight = jax.random.uniform(kw, (1, n), dtype=jnp.float32, minval=-bound, maxval=bound)
    y = linear_forward(x, weight)
    jax.block_until_ready(y)
    y_ref = x @ weight.T
    assert y.shape == (batch, 1)
    assert jnp.allclose(y, y_ref, atol=1e-4, rtol=1e-4), (batch, n)
    return y


if __name__ == "__main__":
    key = jax.random.PRNGKey(0)
    k0, k1, k2 = jax.random.split(key, 3)

    # Primary small demo consistent with Linear(n, 1): batch=8, n=32.
    _check(8, 32, k0)

    # Extra coverage: multi batch-tile with partial last tile + N not a multiple of 128.
    _check(300, 200, k1)

    # Extra coverage: K-split grid axis with a partial (masked) last K block.
    _check(16, _TN_MAX + 128, k2)

    print("KERNEL_OK")
</pallas_src>

<mosaic_0001>
module attributes {stable_mosaic.version = 11 : i64} {
  func.func @_linear_kernel(%arg0: i32, %arg1: i32, %arg2: memref<8x32xf32, #tpu.memory_space<vmem>>, %arg3: memref<1x32xf32, #tpu.memory_space<vmem>>, %arg4: memref<1x8xf32, #tpu.memory_space<vmem>>, %arg5: memref<1x8xf32, #tpu.memory_space<vmem>>) attributes {dimension_semantics = [#tpu.dimension_semantics<parallel>, #tpu.dimension_semantics<arbitrary>], iteration_bounds = array<i64: 1, 1>, scalar_prefetch = 0 : i64, scratch_operands = 1 : i64, tpu.core_type = #tpu.core_type<tc>, window_params = [{transform_indices = @transform_0, window_bounds = array<i64: 8, 32>}, {transform_indices = @transform_1, window_bounds = array<i64: 1, 32>}, {transform_indices = @transform_2, window_bounds = array<i64: 1, 8>}]} {
    %c0_i32 = arith.constant 0 : i32
    %0 = arith.cmpi eq, %arg1, %c0_i32 : i32
    %1 = arith.extui %0 : i1 to i32
    %c0_i32_0 = arith.constant 0 : i32
    %2 = arith.cmpi ne, %1, %c0_i32_0 : i32
    scf.if %2 {
      %cst_10 = arith.constant 0.000000e+00 : f32
      %16 = vector.broadcast %cst_10 : f32 to vector<1x8xf32>
      %c0_11 = arith.constant 0 : index
      %c0_12 = arith.constant 0 : index
      %17 = vector.load %arg5[%c0_11, %c0_12] : memref<1x8xf32, #tpu.memory_space<vmem>>, vector<1x8xf32>
      tpu.vector_store %arg5[%c0_11, %c0_12], %16 {strides = array<i32>} : memref<1x8xf32, #tpu.memory_space<vmem>>, vector<1x8xf32>,
    } else {
    }
    %c0 = arith.constant 0 : index
    %c0_1 = arith.constant 0 : index
    %3 = vector.load %arg2[%c0, %c0_1] : memref<8x32xf32, #tpu.memory_space<vmem>>, vector<8x32xf32>
    %c0_2 = arith.constant 0 : index
    %c0_3 = arith.constant 0 : index
    %4 = vector.load %arg3[%c0_2, %c0_3] : memref<1x32xf32, #tpu.memory_space<vmem>>, vector<1x32xf32>
    %5 = vector.broadcast %4 : vector<1x32xf32> to vector<8x32xf32>
    %6 = arith.mulf %3, %5 : vector<8x32xf32>
    %cst = arith.constant dense<0.000000e+00> : vector<8xf32>
    %7 = vector.multi_reduction <add>, %6, %cst [1] : vector<8x32xf32> to vector<8xf32>
    %8 = vector.shape_cast %7 : vector<8xf32> to vector<8x1xf32>
    %c0_4 = arith.constant 0 : index
    %c0_5 = arith.constant 0 : index
    %9 = vector.load %arg5[%c0_4, %c0_5] : memref<1x8xf32, #tpu.memory_space<vmem>>, vector<1x8xf32>
    %10 = tpu.transpose %8, [1, 0] : vector<8x1xf32> -> vector<1x8xf32>
    %11 = arith.addf %9, %10 : vector<1x8xf32>
    %c0_6 = arith.constant 0 : index
    %c0_7 = arith.constant 0 : index
    %12 = vector.load %arg5[%c0_6, %c0_7] : memref<1x8xf32, #tpu.memory_space<vmem>>, vector<1x8xf32>
    tpu.vector_store %arg5[%c0_6, %c0_7], %11 {strides = array<i32>} : memref<1x8xf32, #tpu.memory_space<vmem>>, vector<1x8xf32>,
    %c0_i32_8 = arith.constant 0 : i32
    %13 = arith.cmpi eq, %arg1, %c0_i32_8 : i32
    %14 = arith.extui %13 : i1 to i32
    %c0_i32_9 = arith.constant 0 : i32
    %15 = arith.cmpi ne, %14, %c0_i32_9 : i32
    scf.if %15 {
      %c0_10 = arith.constant 0 : index
      %c0_11 = arith.constant 0 : index
      %16 = vector.load %arg5[%c0_10, %c0_11] : memref<1x8xf32, #tpu.memory_space<vmem>>, vector<1x8xf32>
      %c0_12 = arith.constant 0 : index
      %c0_13 = arith.constant 0 : index
      %17 = vector.load %arg4[%c0_12, %c0_13] : memref<1x8xf32, #tpu.memory_space<vmem>>, vector<1x8xf32>
      tpu.vector_store %arg4[%c0_12, %c0_13], %16 {strides = array<i32>} : memref<1x8xf32, #tpu.memory_space<vmem>>, vector<1x8xf32>,
    } else {
    }
    return
  }
  func.func @transform_0(%arg0: i32, %arg1: i32) -> (i32, i32) {
    %c0_i32 = arith.constant 0 : i32
    return %arg0, %arg1 : i32, i32
  }
  func.func @transform_1(%arg0: i32, %arg1: i32) -> (i32, i32) {
    %c0_i32 = arith.constant 0 : i32
    %c0_i32_0 = arith.constant 0 : i32
    return %c0_i32, %arg1 : i32, i32
  }
  func.func @transform_2(%arg0: i32, %arg1: i32) -> (i32, i32) {
    %c0_i32 = arith.constant 0 : i32
    %c0_i32_0 = arith.constant 0 : i32
    return %c0_i32, %arg0 : i32, i32
  }
}

</mosaic_0001>

<bundles_post_ra>
// kernel: tpu_custom_call.1
= control target key start
LH: loop header
LB: loop body
LE: loop exit
PB: predicated region body
PF: predicated region fallthrough
CT: control target
= control target key end

     0   :  { %7 = vsyncpa [#allocation4], 0  ;;  %s196_s0 = inlined_call_operand.hbm [shape: f32[8,32], index: 0, kind: input, shape index: {}]   ;;  %s197_s1 = inlined_call_operand.vmem [shape: f32[1,32], index: 1, kind: input, shape index: {}]   ;;  %s198_s2 = inlined_call_operand.hbm [shape: f32[1,8], index: 2, kind: output, shape index: {}]  }
   0x1   :  { %8 = vsyncpa [#allocation5], 0  ;;  %s151_s9 = smov [#allocation3]   ;;  %s103_s13 = scalar_lea.hbm %s196_s0, 128 }
   0x2   :  { %s15_s10 = sshll.u32 %s151_s9, 4  ;;  %p104_p0 = scmp.ne.s32.totalorder %s196_s0, %s103_s13  ;;  %s16_s10 = int_to_ptr.vmem [resolvable:$true] %s15_s10 }
   0x3   :  { %p107_p1 = scmp.lt.u32.totalorder %s103_s13, %s196_s0 }
   0x5   :  { %p109_p2 = pnand %p107_p1, %p104_p0 }
   0x7   :  { %112 = shalt.err (!%p109_p2)
}
   0x8   :  { %s113_s18 = scalar_lea.vmem %s16_s10, 128  ;;  %p118_p4 = scmp.lt.s32.totalorder %s16_s10, %s16_s10 }
   0x9   :  { %p114_p3 = scmp.ne.s32.totalorder %s16_s10, %s113_s18  ;;  %p119_p5 = scmp.lt.s32.totalorder %s113_s18, %s113_s18 }
   0xb   :  { %p120_p6 = por %p119_p5, %p118_p4 }
   0xd   :  { %p121_p7 = pnand %p120_p6, %p114_p3 }
   0xf   :  { %124 = shalt.err (!%p121_p7)
}
  0x10   :  { %18 = dma.hbm_to_vmem [thread:$0]  %s196_s0, 128, %s16_s10, [#allocation4]  }
  0x11   :  { %147 = dma.done.wait [#allocation4], 128  }
  0x12   :  { %148 = vsyncadd [#allocation4], 4294967168  ;;  %v30_v0 = vld [vmem:[#allocation3] sm:$0xff]  ;;  %v99_v1 = vld [vmem:[%s197_s1] ss:$0 sm:$0xff]  ;;  %vm39_vm0 = vcmask 261120  }
  0x13   :  { %v38_v2 = vmul.f32 %v99_v1, %v30_v0  ;;  %vm28_vm1 = vcmask 57344   ;;  %v152_v4 = vmov 0.0   ;;  %s153_s0 = smov [#allocation6]  }
  0x14   :  { %29 = vst.msk [vmem:[#allocation2] sm:$0x1] %vm28_vm1, %v152_v4  ;;  %s90_s23 = sshll.u32 %s153_s0, 4  ;;  %s91_s23 = int_to_ptr.vmem [resolvable:$true] %s90_s23 }
  0x15   :  { %v40_v3 = vsel %vm39_vm0, %v38_v2, 0.0  ;;  %s125_s24 = scalar_lea.vmem %s91_s23, 16  ;;  %s129_s1 = scalar_lea.vmem %s91_s23, 32 }
  0x16   :  { %41 = vadd.xlane.f32.xlu0 %v40_v3  ;;  %p126_p8 = scmp.ne.s32.totalorder %s91_s23, %s125_s24  ;;  %p130_p9 = scmp.lt.s32.totalorder %s91_s23, %s91_s23 }
  0x17   :  { %p131_p10 = scmp.lt.s32.totalorder %s129_s1, %s125_s24 }
  0x19   :  { %p132_p11 = por %p131_p10, %p130_p9 }
  0x1b   :  { %v43_v6 = vld [vmem:[#allocation2] sm:$0x1]  ;;  %p133_p12 = pnand %p132_p11, %p126_p8 }
  0xa3   :  { %v42_v5 = vpop.xlane.xlu0 %41 }
  0xa4   :  { %44 = vxpose.xlu0.b32.start.end [1/1] (short) (narrow) %v42_v5, 8 }
 0x124   :  { %v60_v7 = vpop.trf.xlu0 }
 0x125   :  { %v76_v8 = vadd.f32 %v60_v7, %v43_v6 }
 0x127   :  { %78 = vst.msk [vmem:[#allocation2] sm:$0x1] %vm28_vm1, %v76_v8 }
 0x12e   :  { %v82_v9 = vld [vmem:[#allocation2] sm:$0x1] }
 0x12f   :  { %83 = vst.msk [vmem:[#allocation6] sm:$0x1] %vm28_vm1, %v82_v9 }
 0x130   :  { %136 = shalt.err (!%p133_p12)
}
 0x131   :  { %s137_s27 = scalar_lea.hbm %s198_s2, 16 }
 0x132   :  { %p138_p13 = scmp.ne.s32.totalorder %s198_s2, %s137_s27  ;;  %p141_p0 = scmp.lt.u32.totalorder %s137_s27, %s198_s2 }
 0x134   :  { %p143_p1 = pnand %p141_p0, %p138_p13 }
 0x136   :  { %146 = shalt.err (!%p143_p1)
}
 0x137   :  { %93 = dma.vmem_to_hbm [thread:$0]  %s91_s23, 16, %s198_s2, [#allocation5]  }
 0x138   :  { %149 = dma.done.wait [#allocation5], 16  }
 0x139   :  { %150 = vsyncadd [#allocation5], 4294967280 }
 0x13a   :  { %97 = vsyncpa [#allocation4], 1 }
 0x13b   :  { %98 = vsyncpa [#allocation5], 1 }

</bundles_post_ra>
